<compile_context>
chip_gen: v7x
topology: tpu7x:2x2x1
jax: 0.10.0
libtpu: 0.0.40
codegen_flags: <defaults>
</compile_context>

<pallas_src>
import functools

import jax
import jax.numpy as jnp
from jax.experimental import pallas as pl
from jax.experimental.pallas import tpu as pltpu

_EPS = 1e-6          # torch.pow(10, -6)
_LANES = 128         # vreg lane width


def _layernorm_rows_kernel(alpha_ref, bias_ref, x_ref, o_ref, *, hidden):
    """General path: one normalization group per row, reduce along the lane axis."""
    x = x_ref[...].astype(jnp.float32)                      # (tile_rows, hidden)
    mean = jnp.sum(x, axis=-1, keepdims=True) * (1.0 / hidden)
    centered = x - mean
    # Centered two-pass form (kept instead of E[x^2]-mean^2 to avoid cancellation
    # for low-precision inputs). torch.std uses ddof=1.
    # NOTE: hidden == 1 is degenerate (PyTorch returns NaN there); guarded against
    # a Python division-by-zero only.
    var = jnp.sum(centered * centered, axis=-1, keepdims=True) * (1.0 / max(hidden - 1, 1))
    std = jnp.sqrt(var)
    # EUP reciprocal instead of a VPU divide (approx=False keeps f32 accuracy).
    inv = pl.reciprocal(std + _EPS, approx=False)
    alpha = alpha_ref[0, 0]
    bias = bias_ref[0, 0]
    o_ref[...] = (alpha * centered * inv + bias).astype(o_ref.dtype)


def _layernorm_packed_kernel(alpha_ref, bias_ref, x_ref, seg_ref, o_ref, *, hidden):
    """Lane-dense path for hidden < 128: group = 128 // hidden rows are packed into
    every 128-lane slab row, so loads/stores are full unmasked 128-lane accesses.
    Per-segment sums are computed on the (otherwise idle) MXU with a block-diagonal
    0/1 matrix, which also broadcasts the result back to every lane for free."""
    x = x_ref[...].astype(jnp.float32)                      # (tile_rows, 128)
    seg = seg_ref[...]                                      # (128, 128) block-diag ones
    seg_sum = jnp.dot(x, seg, preferred_element_type=jnp.float32,
                      precision=jax.lax.Precision.HIGHEST)
    mean = seg_sum * (1.0 / hidden)                         # already broadcast per lane
    centered = x - mean
    css = jnp.dot(centered * centered, seg, preferred_element_type=jnp.float32,
                  precision=jax.lax.Precision.HIGHEST)
    std = jnp.sqrt(css * (1.0 / max(hidden - 1, 1)))
    inv = pl.reciprocal(std + _EPS, approx=False)
    alpha = alpha_ref[0, 0]
    bias = bias_ref[0, 0]
    o_ref[...] = (alpha * centered * inv + bias).astype(o_ref.dtype)


def _choose_tile_rows(rows, row_width_elems):
    """Largest row tile (multiple of 8, capped at 1024) whose pipelined buffers
    (2 input + 2 output double-buffers, f32 working copy) stay well under the
    scoped-VMEM default on every generation (v7x: 64 MiB physical / 32 MiB scoped)."""
    vmem_budget_bytes = 16 * 1024 * 1024
    per_row_bytes = 4 * 4 * row_width_elems        # 4 buffers * 4 B/elem
    max_tile = max(8, vmem_budget_bytes // per_row_bytes)
    tile = min(1024, max_tile)
    tile = max(8, (tile // 8) * 8)
    if rows <= tile:
        return rows                                # single block: full-dim block is legal
    return tile


def layer_normalization(x, alpha, bias):
    """x: (..., hidden). alpha, bias: scalar parameters (shape (1,))."""
    orig_shape = x.shape
    hidden = orig_shape[-1]
    rows = 1
    for d in orig_shape[:-1]:
        rows *= d

    alpha2 = jnp.asarray(alpha, jnp.float32).reshape(1, 1)
    bias2 = jnp.asarray(bias, jnp.float32).reshape(1, 1)

    # Row blocks are independent -> shard the grid across TensorCores (v7x has 2).
    compiler_params = pltpu.CompilerParams(dimension_semantics=("parallel",))

    use_packed = (1 < hidden < _LANES and _LANES % hidden == 0
                  and rows % (_LANES // hidden) == 0)

    if use_packed:
        group = _LANES // hidden
        rows_p = rows // group
        # Row-major reshape packs `group` consecutive rows into one 128-lane slab row.
        x2 = x.reshape(rows_p, _LANES)
        seg_id = jnp.arange(_LANES, dtype=jnp.int32) // hidden
        seg = (seg_id[:, None] == seg_id[None, :]).astype(jnp.float32)
        tile = _choose_tile_rows(rows_p, _LANES)
        grid = (pl.cdiv(rows_p, tile),)
        out2 = pl.pallas_call(
            functools.partial(_layernorm_packed_kernel, hidden=hidden),
            out_shape=jax.ShapeDtypeStruct((rows_p, _LANES), x.dtype),
            grid=grid,
            in_specs=[
                pl.BlockSpec(memory_space=pltpu.SMEM),               # alpha
                pl.BlockSpec(memory_space=pltpu.SMEM),               # bias
                pl.BlockSpec((tile, _LANES), lambda i: (i, 0)),      # x slab (pipelined)
                pl.BlockSpec((_LANES, _LANES), lambda i: (0, 0)),    # segment matrix (resident)
            ],
            out_specs=pl.BlockSpec((tile, _LANES), lambda i: (i, 0)),
            compiler_params=compiler_params,
        )(alpha2, bias2, x2, seg)
        return out2.reshape(orig_shape)

    # General path: one normalization group per row.
    x2 = x.reshape(rows, hidden)
    tile = _choose_tile_rows(rows, hidden)
    grid = (pl.cdiv(rows, tile),)
    out2 = pl.pallas_call(
        functools.partial(_layernorm_rows_kernel, hidden=hidden),
        out_shape=jax.ShapeDtypeStruct((rows, hidden), x.dtype),
        grid=grid,
        in_specs=[
            pl.BlockSpec(memory_space=pltpu.SMEM),                   # alpha
            pl.BlockSpec(memory_space=pltpu.SMEM),                   # bias
            pl.BlockSpec((tile, hidden), lambda i: (i, 0)),          # x rows (pipelined)
        ],
        out_specs=pl.BlockSpec((tile, hidden), lambda i: (i, 0)),
        compiler_params=compiler_params,
    )(alpha2, bias2, x2)
    return out2.reshape(orig_shape)


if __name__ == "__main__":
    key = jax.random.PRNGKey(0)
    batch, seq, hidden = 2, 8, 32
    x = jax.random.normal(key, (batch, seq, hidden), dtype=jnp.float32)

    # Deterministic parameter init (matches nn.Parameter(torch.ones(1)/zeros(1))).
    alpha = jnp.ones((1,), jnp.float32)
    bias = jnp.zeros((1,), jnp.float32)

    out = layer_normalization(x, alpha, bias)
    out = jax.block_until_ready(out)

    # Reference check in plain JAX (unbiased std, eps added to std).
    mean = jnp.mean(x, axis=-1, keepdims=True)
    std = jnp.std(x, axis=-1, keepdims=True, ddof=1)
    ref = alpha[0] * (x - mean) / (std + _EPS) + bias[0]
    assert jnp.allclose(out, ref, atol=1e-5, rtol=1e-5), float(jnp.max(jnp.abs(out - ref)))

    print("KERNEL_OK")
</pallas_src>

<mosaic_0001>
module attributes {stable_mosaic.version = 11 : i64} {
  func.func @_layernorm_packed_kernel(%arg0: i32, %arg1: memref<1x1xf32, #tpu.memory_space<smem>>, %arg2: memref<1x1xf32, #tpu.memory_space<smem>>, %arg3: memref<4x128xf32, #tpu.memory_space<vmem>>, %arg4: memref<128x128xf32, #tpu.memory_space<vmem>>, %arg5: memref<4x128xf32, #tpu.memory_space<vmem>>) attributes {dimension_semantics = [#tpu.dimension_semantics<parallel>], iteration_bounds = array<i64: 1>, scalar_prefetch = 0 : i64, scratch_operands = 0 : i64, tpu.core_type = #tpu.core_type<tc>, window_params = [{transform_indices = @transform_0, window_bounds = array<i64: 1, 1>}, {transform_indices = @transform_1, window_bounds = array<i64: 1, 1>}, {transform_indices = @transform_2, window_bounds = array<i64: 4, 128>}, {pipeline_mode = #tpu.pipeline_mode<synchronous>, transform_indices = @transform_3, window_bounds = array<i64: 128, 128>}, {transform_indices = @transform_4, window_bounds = array<i64: 4, 128>}]} {
    %c0 = arith.constant 0 : index
    %c0_0 = arith.constant 0 : index
    %0 = vector.load %arg3[%c0, %c0_0] : memref<4x128xf32, #tpu.memory_space<vmem>>, vector<4x128xf32>
    %c0_1 = arith.constant 0 : index
    %c0_2 = arith.constant 0 : index
    %1 = vector.load %arg4[%c0_1, %c0_2] : memref<128x128xf32, #tpu.memory_space<vmem>>, vector<128x128xf32>
    %cst = arith.constant dense<0.000000e+00> : vector<4x128xf32>
    %2 = tpu.matmul %0, %1, %cst {dimension_numbers = #tpu.dot_dimension_numbers<[1], [0], [0], [1], [0, 0, 1, 1], [], []>, precision = #tpu.contract_precision<fp32>} : vector<4x128xf32>, vector<128x128xf32>, vector<4x128xf32> -> vector<4x128xf32>
    %cst_3 = arith.constant 3.125000e-02 : f32
    %3 = vector.broadcast %cst_3 : f32 to vector<4x128xf32>
    %4 = arith.mulf %2, %3 : vector<4x128xf32>
    %5 = arith.subf %0, %4 : vector<4x128xf32>
    %6 = arith.mulf %5, %5 : vector<4x128xf32>
    %cst_4 = arith.constant dense<0.000000e+00> : vector<4x128xf32>
    %7 = tpu.matmul %6, %1, %cst_4 {dimension_numbers = #tpu.dot_dimension_numbers<[1], [0], [0], [1], [0, 0, 1, 1], [], []>, precision = #tpu.contract_precision<fp32>} : vector<4x128xf32>, vector<128x128xf32>, vector<4x128xf32> -> vector<4x128xf32>
    %cst_5 = arith.constant 0.0322580636 : f32
    %8 = vector.broadcast %cst_5 : f32 to vector<4x128xf32>
    %9 = arith.mulf %7, %8 : vector<4x128xf32>
    %10 = math.sqrt %9 : vector<4x128xf32>
    %cst_6 = arith.constant 9.99999997E-7 : f32
    %11 = vector.broadcast %cst_6 : f32 to vector<4x128xf32>
    %12 = arith.addf %10, %11 : vector<4x128xf32>
    %13 = tpu.reciprocal %12 : vector<4x128xf32> -> vector<4x128xf32>
    %c0_7 = arith.constant 0 : index
    %c0_8 = arith.constant 0 : index
    %14 = memref.load %arg1[%c0_7, %c0_8] : memref<1x1xf32, #tpu.memory_space<smem>>
    %c0_9 = arith.constant 0 : index
    %c0_10 = arith.constant 0 : index
    %15 = memref.load %arg2[%c0_9, %c0_10] : memref<1x1xf32, #tpu.memory_space<smem>>
    %16 = vector.broadcast %14 : f32 to vector<4x128xf32>
    %17 = arith.mulf %16, %5 : vector<4x128xf32>
    %18 = arith.mulf %17, %13 : vector<4x128xf32>
    %19 = vector.broadcast %15 : f32 to vector<4x128xf32>
    %20 = arith.addf %18, %19 : vector<4x128xf32>
    %c0_11 = arith.constant 0 : index
    %c0_12 = arith.constant 0 : index
    %21 = vector.load %arg5[%c0_11, %c0_12] : memref<4x128xf32, #tpu.memory_space<vmem>>, vector<4x128xf32>
    tpu.vector_store %arg5[%c0_11, %c0_12], %20 {strides = array<i32>} : memref<4x128xf32, #tpu.memory_space<vmem>>, vector<4x128xf32>,
    return
  }
  func.func @transform_0(%arg0: i32) -> (i32, i32) {
    %c0_i32 = arith.constant 0 : i32
    %c0_i32_0 = arith.constant 0 : i32
    %c0_i32_1 = arith.constant 0 : i32
    return %c0_i32, %c0_i32_0 : i32, i32
  }
  func.func @transform_1(%arg0: i32) -> (i32, i32) {
    %c0_i32 = arith.constant 0 : i32
    %c0_i32_0 = arith.constant 0 : i32
    %c0_i32_1 = arith.constant 0 : i32
    return %c0_i32, %c0_i32_0 : i32, i32
  }
  func.func @transform_2(%arg0: i32) -> (i32, i32) {
    %c0_i32 = arith.constant 0 : i32
    %c0_i32_0 = arith.constant 0 : i32
    return %arg0, %c0_i32 : i32, i32
  }
  func.func @transform_3(%arg0: i32) -> (i32, i32) {
    %c0_i32 = arith.constant 0 : i32
    %c0_i32_0 = arith.constant 0 : i32
    %c0_i32_1 = arith.constant 0 : i32
    return %c0_i32, %c0_i32_0 : i32, i32
  }
  func.func @transform_4(%arg0: i32) -> (i32, i32) {
    %c0_i32 = arith.constant 0 : i32
    %c0_i32_0 = arith.constant 0 : i32
    return %arg0, %c0_i32 : i32, i32
  }
}

</mosaic_0001>

<bundles_post_ra>
// kernel: tpu_custom_call.1
= control target key start
LH: loop header
LB: loop body
LE: loop exit
PB: predicated region body
PF: predicated region fallthrough
CT: control target
= control target key end

     0   :  { %11 = vsyncpa [#allocation5], 0  ;;  %s2816_s0 = inlined_call_operand.<no memory space> [shape: f32[1,1], index: 0, kind: input, shape index: {}]   ;;  %s2817_s1 = inlined_call_operand.<no memory space> [shape: f32[1,1], index: 1, kind: input, shape index: {}]   ;;  %s2818_s2 = inlined_call_operand.vmem [shape: f32[4,128], index: 2, kind: input, shape index: {}]   ;;  %s2819_s3 = inlined_call_operand.hbm [shape: f32[128,128], index: 3, kind: input, shape index: {}]   ;;  %s2820_s4 = inlined_call_operand.hbm [shape: f32[4,128], index: 4, kind: output, shape index: {}]  }
   0x1   :  { %12 = vsyncpa [#allocation6], 0  ;;  %s2360_s15 = smov [#allocation4]   ;;  %s2312_s19 = scalar_lea.hbm %s2819_s3, 2048 }
   0x2   :  { %s24_s16 = sshll.u32 %s2360_s15, 4  ;;  %p2313_p0 = scmp.ne.s32.totalorder %s2819_s3, %s2312_s19  ;;  %s25_s16 = int_to_ptr.vmem [resolvable:$true] %s24_s16 }
   0x3   :  { %p2316_p1 = scmp.lt.u32.totalorder %s2312_s19, %s2819_s3 }
   0x5   :  { %p2318_p2 = pnand %p2316_p1, %p2313_p0 }
   0x7   :  { %2321 = shalt.err (!%p2318_p2)
}
   0x8   :  { %s2322_s24 = scalar_lea.vmem %s25_s16, 2048  ;;  %p2327_p4 = scmp.lt.s32.totalorder %s25_s16, %s25_s16 }
   0x9   :  { %p2323_p3 = scmp.ne.s32.totalorder %s25_s16, %s2322_s24  ;;  %p2328_p5 = scmp.lt.s32.totalorder %s2322_s24, %s2322_s24 }
   0xb   :  { %p2329_p6 = por %p2328_p5, %p2327_p4 }
   0xd   :  { %p2330_p7 = pnand %p2329_p6, %p2323_p3 }
   0xf   :  { %2333 = shalt.err (!%p2330_p7)
}
  0x10   :  { %s2361_s25 = smov 128   ;;  %s2362_s26 = smov 8  }
  0x11   :  { %30 = dma.hbm_to_vmem [thread:$0]  %s2819_s3, 2048, %s25_s16, [#allocation5], %s2361_s25, %s2361_s25, %s2362_s26  }
  0x12   :  { %2356 = dma.done.wait [#allocation5], 2048  }
  0x13   :  { %2357 = vsyncadd [#allocation5], 4294965248  ;;  %v2363_v0 = vmov 0.0|0.0   ;;  %vm2364_vm0 = vmmov 0   ;;  %v2365_v1 = vmov 0.0   ;;  %v35_v2 = vld [vmem:[#allocation4] sm:$0xff] }
  0x14   :  { %1993 = vmatprep.subr.bf16.mxu0 %v2363_v0  ;;  %1605 = vmatprep.mubr.msk.f32.mxu0 %vm2364_vm0, %v2365_v1  ;;  %v36_v3 = vld [vmem:[#allocation4 + $0x8] sm:$0xff]  ;;  %v37_v4 = vld [vmem:[#allocation4 + $0x10] sm:$0xff]  ;;  %v52_v5 = vand.u32 4294901760, %v35_v2  ;;  %v38_v7 = vld [vmem:[#allocation4 + $0x18] sm:$0xff]  ;;  %s2366_s7 = smov [#allocation7]  }
  0x15   :  { %2137 = vmatprep.subr.bf16.mxu1 %v2363_v0  ;;  %1815 = vmatprep.mubr.msk.f32.mxu1 %vm2364_vm0, %v2365_v1  ;;  %v55_v6 = vand.u32 4294901760, %v36_v3  ;;  %v58_v8 = vand.u32 4294901760, %v37_v4  ;;  %v61_v9 = vand.u32 4294901760, %v38_v7  ;;  %v39_v10 = vld [vmem:[#allocation4 + $0x20] sm:$0xff]  ;;  %v40_v11 = vld [vmem:[#allocation4 + $0x28] sm:$0xff]  ;;  %v41_v16 = vld [vmem:[#allocation4 + $0x30] sm:$0xff] }
  0x16   :  { %v64_v14 = vand.u32 4294901760, %v39_v10  ;;  %v67_v15 = vand.u32 4294901760, %v40_v11  ;;  %v42_v17 = vld [vmem:[#allocation4 + $0x38] sm:$0xff]  ;;  %v70_v19 = vand.u32 4294901760, %v41_v16  ;;  %v43_v21 = vld [vmem:[#allocation4 + $0x40] sm:$0xff]  ;;  %v44_v23 = vld [vmem:[#allocation4 + $0x48] sm:$0xff]  ;;  %v2435_v34 = vsub.f32 %v35_v2, %v52_v5 }
  0x17   :  { %v2410_v12 = vpack.c.bf16 %v55_v6, %v52_v5  ;;  %v2413_v13 = vpack.c.bf16 %v61_v9, %v58_v8  ;;  %v73_v20 = vand.u32 4294901760, %v42_v17  ;;  %v2424_v22 = vld [vmem:[%s2818_s2] sm:$0xf]  ;;  %v45_v24 = vld [vmem:[#allocation4 + $0x50] sm:$0xff]  ;;  %v46_v25 = vld [vmem:[#allocation4 + $0x58] sm:$0xff]  ;;  %v76_v27 = vand.u32 4294901760, %v43_v21 }
  0x18   :  { %v2419_v18 = vpack.c.bf16 %v67_v15, %v64_v14  ;;  %v47_v26 = vld [vmem:[#allocation4 + $0x60] sm:$0xff]  ;;  %v48_v28 = vld [vmem:[#allocation4 + $0x68] sm:$0xff]  ;;  %v49_v29 = vld [vmem:[#allocation4 + $0x70] sm:$0xff]  ;;  %v2430_v31 = vand.u32 4294901760, %v2424_v22  ;;  %v79_v33 = vand.u32 4294901760, %v44_v23  ;;  %v2437_v35 = vsub.f32 %v36_v3, %v55_v6  ;;  %s1360_s8 = sshll.u32 %s2366_s7, 4  ;;  %s1361_s8 = int_to_ptr.vmem [resolvable:$true] %s1360_s8 }
  0x19   :  { %1995 = vmatpush3.bf16.msra.mxu0 %v2410_v12  ;;  %2139 = vmatpush3.bf16.msra.mxu1 %v2410_v12  ;;  %v50_v30 = vld [vmem:[#allocation4 + $0x78] sm:$0xff]  ;;  %v2433_v32 = vpack.c.bf16 %v73_v20, %v70_v19  ;;  %v82_v36 = vand.u32 4294901760, %v45_v24  ;;  %v85_v37 = vand.u32 4294901760, %v46_v25  ;;  %v88_v38 = vand.u32 4294901760, %v47_v26  ;;  %s2334_s9 = scalar_lea.vmem %s1361_s8, 64  ;;  %p2339_p9 = scmp.lt.s32.totalorder %s1361_s8, %s1361_s8 }
  0x1a   :  { %1996 = vmatprep.subr.bf16.mxu0 %v2363_v0  ;;  %2140 = vmatprep.subr.bf16.mxu1 %v2363_v0  ;;  %v91_v39 = vand.u32 4294901760, %v48_v28  ;;  %v94_v40 = vand.u32 4294901760, %v49_v29  ;;  %v97_v41 = vand.u32 4294901760, %v50_v30  ;;  %v2444_v42 = vsub.f32 %v2424_v22, %v2430_v31  ;;  %p2335_p8 = scmp.ne.s32.totalorder %s1361_s8, %s2334_s9  ;;  %p2340_p10 = scmp.lt.s32.totalorder %s2334_s9, %s2334_s9 }
  0x1b   :  { %v2446_v43 = vsub.f32 %v37_v4, %v58_v8  ;;  %v2449_v44 = vpack.c.bf16 %v79_v33, %v76_v27  ;;  %v145_v45 = vand.u32 4294901760, %v2435_v34  ;;  %v152_v46 = vand.u32 4294901760, %v2437_v35 }
  0x1c   :  { %v2453_v47 = vsub.f32 %v38_v7, %v61_v9  ;;  %v2457_v48 = vsub.f32 %v39_v10, %v64_v14  ;;  %v2460_v49 = vpack.c.bf16 %v85_v37, %v82_v36  ;;  %v2462_v50 = vpack.c.bf16 %v91_v39, %v88_v38  ;;  %p2341_p11 = por %p2340_p10, %p2339_p9 }
  0x1d   :  { %1998 = vmatpush3.bf16.msra.mxu0 %v2413_v13  ;;  %2142 = vmatpush3.bf16.msra.mxu1 %v2413_v13  ;;  %v2464_v51 = vpack.c.bf16 %v97_v41, %v94_v40  ;;  %v134_v52 = vand.u32 4294901760, %v2444_v42  ;;  %v159_v53 = vand.u32 4294901760, %v2446_v43  ;;  %v2468_v54 = vsub.f32 %v40_v11, %v67_v15 }
  0x1e   :  { %1999 = vmatprep.subr.bf16.mxu0 %v2363_v0  ;;  %2143 = vmatprep.subr.bf16.mxu1 %v2363_v0  ;;  %v2470_v55 = vsub.f32 %v41_v16, %v70_v19  ;;  %v146_v56 = vsub.f32 %v2435_v34, %v145_v45  ;;  %v153_v57 = vsub.f32 %v2437_v35, %v152_v46  ;;  %v166_v58 = vand.u32 4294901760, %v2453_v47  ;;  %p2342_p12 = pnand %p2341_p11, %p2335_p8 }
  0x1f   :  { %v2476_v59 = vsub.f32 %v42_v17, %v73_v20  ;;  %v173_v60 = vand.u32 4294901760, %v2457_v48  ;;  %v2481_v61 = vsub.f32 %v43_v21, %v76_v27  ;;  %v2483_v62 = vsub.f32 %v44_v23, %v79_v33 }
  0x20   :  { %v2485_v63 = vsub.f32 %v45_v24, %v82_v36  ;;  %v2488_v2 = vsub.f32 %v46_v25, %v85_v37  ;;  %v2490_v3 = vsub.f32 %v47_v26, %v88_v38  ;;  %v2492_v4 = vsub.f32 %v48_v28, %v91_v39 }
  0x21   :  { %2001 = vmatpush3.bf16.msra.mxu0 %v2419_v18  ;;  %2145 = vmatpush3.bf16.msra.mxu1 %v2419_v18  ;;  %v2494_v5 = vsub.f32 %v49_v29, %v94_v40  ;;  %v135_v6 = vsub.f32 %v2444_v42, %v134_v52  ;;  %v160_v7 = vsub.f32 %v2446_v43, %v159_v53  ;;  %v180_v8 = vand.u32 4294901760, %v2468_v54 }
  0x22   :  { %2002 = vmatprep.subr.bf16.mxu0 %v2363_v0  ;;  %2146 = vmatprep.subr.bf16.mxu1 %v2363_v0  ;;  %v2501_v9 = vsub.f32 %v50_v30, %v97_v41  ;;  %v147_v10 = vand.u32 4294901760, %v146_v56  ;;  %v154_v11 = vand.u32 4294901760, %v153_v57  ;;  %v167_v14 = vsub.f32 %v2453_v47, %v166_v58 }
  0x23   :  { %v187_v15 = vand.u32 4294901760, %v2470_v55  ;;  %v194_v16 = vand.u32 4294901760, %v2476_v59  ;;  %v201_v17 = vand.u32 4294901760, %v2481_v61  ;;  %v208_v19 = vand.u32 4294901760, %v2483_v62 }
  0x24   :  { %v215_v20 = vand.u32 4294901760, %v2485_v63  ;;  %v222_v21 = vand.u32 4294901760, %v2488_v2  ;;  %v229_v23 = vand.u32 4294901760, %v2490_v3  ;;  %v236_v24 = vand.u32 4294901760, %v2492_v4 }
  0x25   :  { %2004 = vmatpush3.bf16.msra.mxu0 %v2433_v32  ;;  %2148 = vmatpush3.bf16.msra.mxu1 %v2433_v32  ;;  %v243_v25 = vand.u32 4294901760, %v2494_v5  ;;  %v250_v26 = vand.u32 4294901760, %v2501_v9  ;;  %v2518_v27 = vpack.c.bf16 %v152_v46, %v145_v45  ;;  %v2520_v28 = vpack.c.bf16 %v166_v58, %v159_v53 }
  0x26   :  { %2005 = vmatprep.subr.bf16.mxu0 %v2363_v0  ;;  %2149 = vmatprep.subr.bf16.mxu1 %v2363_v0  ;;  %v2522_v29 = vpack.c.bf16 %v180_v8, %v173_v60  ;;  %v2525_v30 = vpack.c.bf16 %v194_v16, %v187_v15  ;;  %v2527_v33 = vpack.c.bf16 %v208_v19, %v201_v17  ;;  %v136_v39 = vand.u32 4294901760, %v135_v6 }
  0x27   :  { %v2529_v36 = vpack.c.bf16 %v222_v21, %v215_v20  ;;  %v2531_v37 = vpack.c.bf16 %v236_v24, %v229_v23  ;;  %v2534_v38 = vpack.c.bf16 %v250_v26, %v243_v25  ;;  %v174_v40 = vsub.f32 %v2457_v48, %v173_v60 }
  0x28   :  { %v2540_v41 = vpack.c.bf16 %v154_v11, %v147_v10  ;;  %v161_v45 = vand.u32 4294901760, %v160_v7  ;;  %v168_v46 = vand.u32 4294901760, %v167_v14  ;;  %v181_v53 = vsub.f32 %v2468_v54, %v180_v8 }
  0x29   :  { %2007 = vmatpush3.bf16.msra.mxu0 %v2449_v44  ;;  %2151 = vmatpush3.bf16.msra.mxu1 %v2449_v44  ;;  %v188_v56 = vsub.f32 %v2470_v55, %v187_v15  ;;  %v175_v58 = vand.u32 4294901760, %v174_v40  ;;  %v195_v6 = vsub.f32 %v2476_v59, %v194_v16  ;;  %v202_v11 = vsub.f32 %v2481_v61, %v201_v17 }
  0x2a   :  { %2008 = vmatprep.subr.bf16.mxu0 %v2363_v0  ;;  %2152 = vmatprep.subr.bf16.mxu1 %v2363_v0  ;;  %v2548_v57 = vpack.c.bf16 %v168_v46, %v161_v45  ;;  %v182_v60 = vand.u32 4294901760, %v181_v53  ;;  %v209_v14 = vsub.f32 %v2483_v62, %v208_v19  ;;  %v216_v15 = vsub.f32 %v2485_v63, %v215_v20 }
  0x2b   :  { %v189_v7 = vand.u32 4294901760, %v188_v56  ;;  %v196_v10 = vand.u32 4294901760, %v195_v6  ;;  %v223_v45 = vsub.f32 %v2488_v2, %v222_v21  ;;  %v230_v46 = vsub.f32 %v2490_v3, %v229_v23 }
  0x2c   :  { %v2555_v8 = vpack.c.bf16 %v182_v60, %v175_v58  ;;  %v210_v40 = vand.u32 4294901760, %v209_v14  ;;  %v217_v19 = vand.u32 4294901760, %v216_v15  ;;  %v237_v20 = vsub.f32 %v2492_v4, %v236_v24 }
  0x2d   :  { %2010 = vmatpush3.bf16.msra.mxu0 %v2460_v49  ;;  %2154 = vmatpush3.bf16.msra.mxu1 %v2460_v49  ;;  %v2562_v16 = vpack.c.bf16 %v196_v10, %v189_v7  ;;  %v224_v53 = vand.u32 4294901760, %v223_v45  ;;  %v244_v56 = vsub.f32 %v2494_v5, %v243_v25  ;;  %v231_v21 = vand.u32 4294901760, %v230_v46 }
  0x2e   :  { %2011 = vmatprep.subr.bf16.mxu0 %v2363_v0  ;;  %2155 = vmatprep.subr.bf16.mxu1 %v2363_v0  ;;  %v238_v60 = vand.u32 4294901760, %v237_v20  ;;  %v251_v23 = vsub.f32 %v2501_v9, %v250_v26  ;;  %v2589_v26 = vpack.c.bf16 %v2437_v35, %v2435_v34  ;;  %v2596_v10 = vpack.c.bf16 %v2453_v47, %v2446_v43 }
  0x2f   :  { %v2574_v58 = vpack.c.bf16 %v224_v53, %v217_v19  ;;  %v245_v7 = vand.u32 4294901760, %v244_v56  ;;  %v2604_v34 = vpack.c.bf16 %v2468_v54, %v2457_v48  ;;  %v2610_v35 = vpack.c.bf16 %v2476_v59, %v2470_v55 }
  0x30   :  { %v2579_v6 = vpack.c.bf16 %v238_v60, %v231_v21  ;;  %v252_v24 = vand.u32 4294901760, %v251_v23  ;;  %v2616_v43 = vpack.c.bf16 %v2483_v62, %v2481_v61  ;;  %v2622_v47 = vpack.c.bf16 %v2488_v2, %v2485_v63 }
  0x31   :  { %2013 = vmatpush3.bf16.msra.mxu0 %v2462_v50  ;;  %2157 = vmatpush3.bf16.msra.mxu1 %v2462_v50  ;;  %v2628_v48 = vpack.c.bf16 %v2492_v4, %v2490_v3  ;;  %v2634_v54 = vpack.c.bf16 %v2501_v9, %v2494_v5  ;;  %v1351_v5 = vstv %s2817_s1 }
  0x32   :  { %2014 = vmatprep.subr.bf16.mxu0 %v2363_v0  ;;  %2158 = vmatprep.subr.bf16.mxu1 %v2363_v0  ;;  %v2583_v25 = vpack.c.bf16 %v252_v24, %v245_v7 }
  0x35   :  { %2016 = vmatpush3.bf16.msra.mxu0 %v2464_v51  ;;  %2160 = vmatpush3.bf16.msra.mxu1 %v2464_v51 }
  0x36   :  { %2017 = vmatprep.subr.bf16.mxu0 %v2363_v0  ;;  %2161 = vmatprep.subr.bf16.mxu1 %v2363_v0 }
  0x38   :  { %1606 = vmatmul.mubr.f32.vlgmr.msra.gmra.mrb[0].mxu0 %v136_v39  ;;  %v203_v39 = vand.u32 4294901760, %v202_v11 }
  0x39   :  { %2019 = vmatpush3.bf16.msra.mxu0 %v2540_v41  ;;  %1640 = vmatprep.mubr.msk.f32.mxu0 %vm2364_vm0, %v2365_v1 }
  0x3a   :  { %2020 = vmatprep.subr.bf16.mxu0 %v2363_v0  ;;  %v2568_v17 = vpack.c.bf16 %v210_v40, %v203_v39 }
  0x3d   :  { %2022 = vmatpush3.bf16.msra.mxu0 %v2548_v57 }
  0x3e   :  { %2023 = vmatprep.subr.bf16.mxu0 %v2363_v0 }
  0x41   :  { %2025 = vmatpush3.bf16.msra.mxu0 %v2555_v8 }
  0x42   :  { %2026 = vmatprep.subr.bf16.mxu0 %v2363_v0 }
  0x45   :  { %2028 = vmatpush3.bf16.msra.mxu0 %v2562_v16 }
  0x46   :  { %2029 = vmatprep.subr.bf16.mxu0 %v2363_v0 }
  0x49   :  { %2031 = vmatpush3.bf16.msra.mxu0 %v2568_v17 }
  0x4a   :  { %2032 = vmatprep.subr.bf16.mxu0 %v2363_v0 }
  0x4d   :  { %2034 = vmatpush3.bf16.msra.mxu0 %v2574_v58 }
  0x4e   :  { %2035 = vmatprep.subr.bf16.mxu0 %v2363_v0 }
  0x51   :  { %2037 = vmatpush3.bf16.msra.mxu0 %v2579_v6 }
  0x52   :  { %2038 = vmatprep.subr.bf16.mxu0 %v2363_v0 }
  0x55   :  { %2040 = vmatpush3.bf16.msra.mxu0 %v2583_v25 }
  0x56   :  { %2041 = vmatprep.subr.bf16.mxu0 %v2363_v0 }
  0x58   :  { %1641 = vmatmul.mubr.f32.vlgmr.msra.gmra.mrb[0].mxu0 %v2430_v31 }
  0x59   :  { %2043 = vmatpush3.bf16.msra.mxu0 %v2589_v26  ;;  %1675 = vmatprep.mubr.msk.f32.mxu0 %vm2364_vm0, %v2365_v1 }
  0x5a   :  { %2044 = vmatprep.subr.bf16.mxu0 %v2363_v0 }
  0x5d   :  { %2046 = vmatpush3.bf16.msra.mxu0 %v2596_v10 }
  0x5e   :  { %2047 = vmatprep.subr.bf16.mxu0 %v2363_v0 }
  0x61   :  { %2049 = vmatpush3.bf16.msra.mxu0 %v2604_v34 }
  0x62   :  { %2050 = vmatprep.subr.bf16.mxu0 %v2363_v0 }
  0x65   :  { %2052 = vmatpush3.bf16.msra.mxu0 %v2610_v35 }
  0x66   :  { %2053 = vmatprep.subr.bf16.mxu0 %v2363_v0 }
  0x69   :  { %2055 = vmatpush3.bf16.msra.mxu0 %v2616_v43 }
  0x6a   :  { %2056 = vmatprep.subr.bf16.mxu0 %v2363_v0 }
  0x6d   :  { %2058 = vmatpush3.bf16.msra.mxu0 %v2622_v47 }
  0x6e   :  { %2059 = vmatprep.subr.bf16.mxu0 %v2363_v0 }
  0x71   :  { %2061 = vmatpush3.bf16.msra.mxu0 %v2628_v48 }
  0x72   :  { %2062 = vmatprep.subr.bf16.mxu0 %v2363_v0 }
  0x75   :  { %2064 = vmatpush3.bf16.msra.mxu0 %v2634_v54 }
  0x76   :  { %2065 = vmatprep.subr.bf16.mxu0 %v2363_v0 }
  0x78   :  { %1676 = vmatmul.mubr.f32.vlgmr.msra.gmra.mrb[0].mxu0 %v2444_v42 }
  0x79   :  { %2067 = vmatpush3.bf16.msra.mxu0 %v2410_v12  ;;  %1710 = vmatprep.mubr.msk.f32.mxu0 %vm2364_vm0, %v2365_v1 }
  0x7a   :  { %2068 = vmatprep.subr.bf16.mxu0 %v2363_v0 }
  0x7d   :  { %2070 = vmatpush3.bf16.msra.mxu0 %v2413_v13 }
  0x7e   :  { %2071 = vmatprep.subr.bf16.mxu0 %v2363_v0 }
  0x81   :  { %2073 = vmatpush3.bf16.msra.mxu0 %v2419_v18 }
  0x82   :  { %2074 = vmatprep.subr.bf16.mxu0 %v2363_v0 }
  0x85   :  { %2076 = vmatpush3.bf16.msra.mxu0 %v2433_v32 }
  0x86   :  { %2077 = vmatprep.subr.bf16.mxu0 %v2363_v0 }
  0x89   :  { %2079 = vmatpush3.bf16.msra.mxu0 %v2449_v44 }
  0x8a   :  { %2080 = vmatprep.subr.bf16.mxu0 %v2363_v0 }
  0x8d   :  { %2082 = vmatpush3.bf16.msra.mxu0 %v2460_v49 }
  0x8e   :  { %2083 = vmatprep.subr.bf16.mxu0 %v2363_v0 }
  0x91   :  { %2085 = vmatpush3.bf16.msra.mxu0 %v2462_v50 }
  0x92   :  { %2086 = vmatprep.subr.bf16.mxu0 %v2363_v0 }
  0x95   :  { %2088 = vmatpush3.bf16.msra.mxu0 %v2464_v51 }
  0x96   :  { %2089 = vmatprep.subr.bf16.mxu0 %v2363_v0 }
  0x98   :  { %1711 = vmatmul.mubr.f32.vlgmr.msra.gmra.mrb[0].mxu0 %v134_v52 }
  0x99   :  { %2091 = vmatpush3.bf16.msra.mxu0 %v2518_v27  ;;  %1745 = vmatprep.mubr.msk.f32.mxu0 %vm2364_vm0, %v2365_v1 }
  0x9a   :  { %2092 = vmatprep.subr.bf16.mxu0 %v2363_v0 }
  0x9d   :  { %2094 = vmatpush3.bf16.msra.mxu0 %v2520_v28 }
  0x9e   :  { %2095 = vmatprep.subr.bf16.mxu0 %v2363_v0 }
  0xa1   :  { %2097 = vmatpush3.bf16.msra.mxu0 %v2522_v29 }
  0xa2   :  { %2098 = vmatprep.subr.bf16.mxu0 %v2363_v0 }
  0xa5   :  { %2100 = vmatpush3.bf16.msra.mxu0 %v2525_v30 }
  0xa6   :  { %2101 = vmatprep.subr.bf16.mxu0 %v2363_v0 }
  0xa9   :  { %2103 = vmatpush3.bf16.msra.mxu0 %v2527_v33 }
  0xaa   :  { %2104 = vmatprep.subr.bf16.mxu0 %v2363_v0 }
  0xad   :  { %2106 = vmatpush3.bf16.msra.mxu0 %v2529_v36 }
  0xae   :  { %2107 = vmatprep.subr.bf16.mxu0 %v2363_v0 }
  0xb1   :  { %2109 = vmatpush3.bf16.msra.mxu0 %v2531_v37 }
  0xb2   :  { %2110 = vmatprep.subr.bf16.mxu0 %v2363_v0 }
  0xb5   :  { %2112 = vmatpush3.bf16.msra.mxu0 %v2534_v38 }
  0xb6   :  { %2113 = vmatprep.subr.bf16.mxu0 %v2363_v0 }
  0xb8   :  { %1746 = vmatmul.mubr.f32.vlgmr.msra.gmra.mrb[0].mxu0 %v2430_v31 }
  0xb9   :  { %2115 = vmatpush3.bf16.msra.mxu0 %v2410_v12  ;;  %1780 = vmatprep.mubr.msk.f32.mxu0 %vm2364_vm0, %v2365_v1 }
  0xba   :  { %2116 = vmatprep.subr.bf16.mxu0 %v2363_v0 }
  0xbd   :  { %2118 = vmatpush3.bf16.msra.mxu0 %v2413_v13 }
  0xbe   :  { %2119 = vmatprep.subr.bf16.mxu0 %v2363_v0 }
  0xc1   :  { %2121 = vmatpush3.bf16.msra.mxu0 %v2419_v18 }
  0xc2   :  { %2122 = vmatprep.subr.bf16.mxu0 %v2363_v0 }
  0xc5   :  { %2124 = vmatpush3.bf16.msra.mxu0 %v2433_v32 }
  0xc6   :  { %2125 = vmatprep.subr.bf16.mxu0 %v2363_v0 }
  0xc9   :  { %2127 = vmatpush3.bf16.msra.mxu0 %v2449_v44 }
  0xca   :  { %2128 = vmatprep.subr.bf16.mxu0 %v2363_v0 }
  0xcd   :  { %2130 = vmatpush3.bf16.msra.mxu0 %v2460_v49 }
  0xce   :  { %2131 = vmatprep.subr.bf16.mxu0 %v2363_v0 }
  0xd1   :  { %2133 = vmatpush3.bf16.msra.mxu0 %v2462_v50 }
  0xd2   :  { %2134 = vmatprep.subr.bf16.mxu0 %v2363_v0 }
  0xd5   :  { %2136 = vmatpush3.bf16.msra.mxu0 %v2464_v51 }
  0xd8   :  { %1781 = vmatmul.mubr.f32.vlgmr.msra.gmra.mrb[0].mxu0 %v2430_v31 }
 0x1ab   :  { %v688_v42 = vpop.f32.mrb[0].mxu0 }
 0x1ac   :  { %v692_v52 = vmul.f32 0.03125, %v688_v42  ;;  %v1782_v55 = vpop.f32.mrb[1].mxu0 }
 0x1ae   :  { %v2698_v59 = vsub.f32 %v2424_v22, %v692_v52 }
 0x1b0   :  { %v694_v61 = vmul.f32 %v2698_v59, %v2698_v59 }
 0x1b2   :  { %v2702_v62 = vand.u32 4294901760, %v694_v61 }
 0x1b4   :  { %v777_v63 = vsub.f32 %v694_v61, %v2702_v62 }
 0x1b6   :  { %v778_v2 = vand.u32 4294901760, %v777_v63 }
 0x1b8   :  { %v779_v3 = vsub.f32 %v777_v63, %v778_v2 }
 0x1ba   :  { %v780_v4 = vand.u32 4294901760, %v779_v3 }
 0x1bc   :  { %1816 = vmatmul.mubr.f32.vlgmr.msra.gmra.mrb[0].mxu1 %v780_v4 }
 0x1bd   :  { %2163 = vmatpush3.bf16.msra.mxu1 %v2540_v41  ;;  %1850 = vmatprep.mubr.msk.f32.mxu1 %vm2364_vm0, %v2365_v1 }
 0x1be   :  { %2164 = vmatprep.subr.bf16.mxu1 %v2363_v0 }
 0x1c1   :  { %2166 = vmatpush3.bf16.msra.mxu1 %v2548_v57 }
 0x1c2   :  { %2167 = vmatprep.subr.bf16.mxu1 %v2363_v0 }
 0x1c5   :  { %2169 = vmatpush3.bf16.msra.mxu1 %v2555_v8 }
 0x1c6   :  { %2170 = vmatprep.subr.bf16.mxu1 %v2363_v0 }
 0x1c9   :  { %2172 = vmatpush3.bf16.msra.mxu1 %v2562_v16 }
 0x1ca   :  { %2173 = vmatprep.subr.bf16.mxu1 %v2363_v0 }
 0x1cd   :  { %2175 = vmatpush3.bf16.msra.mxu1 %v2568_v17 }
 0x1ce   :  { %2176 = vmatprep.subr.bf16.mxu1 %v2363_v0 }
 0x1d1   :  { %2178 = vmatpush3.bf16.msra.mxu1 %v2574_v58 }
 0x1d2   :  { %2179 = vmatprep.subr.bf16.mxu1 %v2363_v0 }
 0x1d5   :  { %2181 = vmatpush3.bf16.msra.mxu1 %v2579_v6 }
 0x1d6   :  { %2182 = vmatprep.subr.bf16.mxu1 %v2363_v0 }
 0x1d9   :  { %2184 = vmatpush3.bf16.msra.mxu1 %v2583_v25 }
 0x1da   :  { %2185 = vmatprep.subr.bf16.mxu1 %v2363_v0 }
 0x1dc   :  { %1851 = vmatmul.mubr.f32.vlgmr.msra.gmra.mrb[0].mxu1 %v2702_v62 }
 0x1dd   :  { %2187 = vmatpush3.bf16.msra.mxu1 %v2589_v26  ;;  %1885 = vmatprep.mubr.msk.f32.mxu1 %vm2364_vm0, %v2365_v1 }
 0x1de   :  { %2188 = vmatprep.subr.bf16.mxu1 %v2363_v0 }
 0x1e1   :  { %2190 = vmatpush3.bf16.msra.mxu1 %v2596_v10 }
 0x1e2   :  { %2191 = vmatprep.subr.bf16.mxu1 %v2363_v0 }
 0x1e5   :  { %2193 = vmatpush3.bf16.msra.mxu1 %v2604_v34 }
 0x1e6   :  { %2194 = vmatprep.subr.bf16.mxu1 %v2363_v0 }
 0x1e9   :  { %2196 = vmatpush3.bf16.msra.mxu1 %v2610_v35 }
 0x1ea   :  { %2197 = vmatprep.subr.bf16.mxu1 %v2363_v0 }
 0x1ed   :  { %2199 = vmatpush3.bf16.msra.mxu1 %v2616_v43 }
 0x1ee   :  { %2200 = vmatprep.subr.bf16.mxu1 %v2363_v0 }
 0x1f1   :  { %2202 = vmatpush3.bf16.msra.mxu1 %v2622_v47 }
 0x1f2   :  { %2203 = vmatprep.subr.bf16.mxu1 %v2363_v0 }
 0x1f5   :  { %2205 = vmatpush3.bf16.msra.mxu1 %v2628_v48 }
 0x1f6   :  { %2206 = vmatprep.subr.bf16.mxu1 %v2363_v0 }
 0x1f9   :  { %2208 = vmatpush3.bf16.msra.mxu1 %v2634_v54 }
 0x1fa   :  { %2209 = vmatprep.subr.bf16.mxu1 %v2363_v0 }
 0x1fc   :  { %1886 = vmatmul.mubr.f32.vlgmr.msra.gmra.mrb[0].mxu1 %v777_v63 }
 0x1fd   :  { %2211 = vmatpush3.bf16.msra.mxu1 %v2410_v12  ;;  %1920 = vmatprep.mubr.msk.f32.mxu1 %vm2364_vm0, %v2365_v1 }
 0x1fe   :  { %2212 = vmatprep.subr.bf16.mxu1 %v2363_v0 }
 0x201   :  { %2214 = vmatpush3.bf16.msra.mxu1 %v2413_v13 }
 0x202   :  { %2215 = vmatprep.subr.bf16.mxu1 %v2363_v0 }
 0x205   :  { %2217 = vmatpush3.bf16.msra.mxu1 %v2419_v18 }
 0x206   :  { %2218 = vmatprep.subr.bf16.mxu1 %v2363_v0 }
 0x209   :  { %2220 = vmatpush3.bf16.msra.mxu1 %v2433_v32 }
 0x20a   :  { %2221 = vmatprep.subr.bf16.mxu1 %v2363_v0 }
 0x20d   :  { %2223 = vmatpush3.bf16.msra.mxu1 %v2449_v44 }
 0x20e   :  { %2224 = vmatprep.subr.bf16.mxu1 %v2363_v0 }
 0x211   :  { %2226 = vmatpush3.bf16.msra.mxu1 %v2460_v49 }
 0x212   :  { %2227 = vmatprep.subr.bf16.mxu1 %v2363_v0 }
 0x215   :  { %2229 = vmatpush3.bf16.msra.mxu1 %v2462_v50 }
 0x216   :  { %2230 = vmatprep.subr.bf16.mxu1 %v2363_v0 }
 0x219   :  { %2232 = vmatpush3.bf16.msra.mxu1 %v2464_v51 }
 0x21a   :  { %2233 = vmatprep.subr.bf16.mxu1 %v2363_v0 }
 0x21c   :  { %1921 = vmatmul.mubr.f32.vlgmr.msra.gmra.mrb[0].mxu1 %v778_v2 }
 0x21d   :  { %2235 = vmatpush3.bf16.msra.mxu1 %v2518_v27  ;;  %1955 = vmatprep.mubr.msk.f32.mxu1 %vm2364_vm0, %v2365_v1 }
 0x21e   :  { %2236 = vmatprep.subr.bf16.mxu1 %v2363_v0 }
 0x221   :  { %2238 = vmatpush3.bf16.msra.mxu1 %v2520_v28 }
 0x222   :  { %2239 = vmatprep.subr.bf16.mxu1 %v2363_v0 }
 0x225   :  { %2241 = vmatpush3.bf16.msra.mxu1 %v2522_v29 }
 0x226   :  { %2242 = vmatprep.subr.bf16.mxu1 %v2363_v0 }
 0x229   :  { %2244 = vmatpush3.bf16.msra.mxu1 %v2525_v30 }
 0x22a   :  { %2245 = vmatprep.subr.bf16.mxu1 %v2363_v0 }
 0x22d   :  { %2247 = vmatpush3.bf16.msra.mxu1 %v2527_v33 }
 0x22e   :  { %2248 = vmatprep.subr.bf16.mxu1 %v2363_v0 }
 0x231   :  { %2250 = vmatpush3.bf16.msra.mxu1 %v2529_v36 }
 0x232   :  { %2251 = vmatprep.subr.bf16.mxu1 %v2363_v0 }
 0x235   :  { %2253 = vmatpush3.bf16.msra.mxu1 %v2531_v37 }
 0x236   :  { %2254 = vmatprep.subr.bf16.mxu1 %v2363_v0 }
 0x239   :  { %2256 = vmatpush3.bf16.msra.mxu1 %v2534_v38 }
 0x23a   :  { %2257 = vmatprep.subr.bf16.mxu1 %v2363_v0 }
 0x23c   :  { %1956 = vmatmul.mubr.f32.vlgmr.msra.gmra.mrb[0].mxu1 %v2702_v62 }
 0x23d   :  { %2259 = vmatpush3.bf16.msra.mxu1 %v2410_v12  ;;  %1990 = vmatprep.mubr.msk.f32.mxu1 %vm2364_vm0, %v2365_v1 }
 0x23e   :  { %2260 = vmatprep.subr.bf16.mxu1 %v2363_v0 }
 0x241   :  { %2262 = vmatpush3.bf16.msra.mxu1 %v2413_v13 }
 0x242   :  { %2263 = vmatprep.subr.bf16.mxu1 %v2363_v0 }
 0x245   :  { %2265 = vmatpush3.bf16.msra.mxu1 %v2419_v18 }
 0x246   :  { %2266 = vmatprep.subr.bf16.mxu1 %v2363_v0 }
 0x249   :  { %2268 = vmatpush3.bf16.msra.mxu1 %v2433_v32 }
 0x24a   :  { %2269 = vmatprep.subr.bf16.mxu1 %v2363_v0 }
 0x24d   :  { %2271 = vmatpush3.bf16.msra.mxu1 %v2449_v44 }
 0x24e   :  { %2272 = vmatprep.subr.bf16.mxu1 %v2363_v0 }
 0x251   :  { %2274 = vmatpush3.bf16.msra.mxu1 %v2460_v49 }
 0x252   :  { %2275 = vmatprep.subr.bf16.mxu1 %v2363_v0 }
 0x255   :  { %2277 = vmatpush3.bf16.msra.mxu1 %v2462_v50 }
 0x256   :  { %2278 = vmatprep.subr.bf16.mxu1 %v2363_v0  ;;  %v1348_v0 = vstv %s2816_s0 }
 0x257   :  { %v1349_v50 = vmul.f32 %v1348_v0, %v2698_v59 }
 0x259   :  { %2280 = vmatpush3.bf16.msra.mxu1 %v2464_v51 }
 0x25c   :  { %1991 = vmatmul.mubr.f32.vlgmr.msra.gmra.mrb[0].mxu1 %v2702_v62 }
 0x32f   :  { %v1332_v1 = vpop.f32.mrb[0].mxu1 }
 0x330   :  { %v1336_v12 = vmul.f32 0.032258064, %v1332_v1  ;;  %v1992_v13 = vpop.f32.mrb[1].mxu1 }
 0x332   :  { %2308 = vrsqrt.f32 %v1336_v12  ;;  %vm1339_vm1 = vcmp.eq.f32.partialorder %v1336_v12, inf  ;;  %v1342_v31 = vand.u32 2147483648, %v1336_v12  ;;  %vm1341_vm2 = vcmp.eq.f32.partialorder %v1336_v12, 0.0 }
 0x33c   :  { %v2309_v18 = vpop.eup %2308 }
 0x33d   :  { %v1338_v22 = vmul.f32 %v2309_v18, %v1336_v12 }
 0x33f   :  { %v1340_v32 = vsel %vm1339_vm1, %v1336_v12, %v1338_v22 }
 0x340   :  { %v1343_v44 = vsel %vm1341_vm2, %v1342_v31, %v1340_v32 }
 0x341   :  { %v1344_v49 = vadd.f32 1e-06, %v1343_v44 }
 0x343   :  { %2310 = vrcp.f32 %v1344_v49 }
 0x34d   :  { %v2311_v51 = vpop.eup %2310 }
 0x34e   :  { %v1350_v9 = vmul.f32 %v2311_v51, %v1349_v50 }
 0x350   :  { %v1352_v27 = vadd.f32 %v1351_v5, %v1350_v9 }
 0x352   :  { %1353 = vst [vmem:[#allocation7] sm:$0xf] %v1352_v27 }
 0x353   :  { %2345 = shalt.err (!%p2342_p12)
}
 0x354   :  { %s2346_s11 = scalar_lea.hbm %s2820_s4, 64 }
 0x355   :  { %p2347_p13 = scmp.ne.s32.totalorder %s2820_s4, %s2346_s11  ;;  %p2350_p0 = scmp.lt.u32.totalorder %s2346_s11, %s2820_s4 }
 0x357   :  { %p2352_p1 = pnand %p2350_p0, %p2347_p13 }
 0x359   :  { %2355 = shalt.err (!%p2352_p1)
}
 0x35a   :  { %1363 = dma.vmem_to_hbm [thread:$0]  %s1361_s8, 64, %s2820_s4, [#allocation6]  }
 0x35b   :  { %2358 = dma.done.wait [#allocation6], 64  }
 0x35c   :  { %2359 = vsyncadd [#allocation6], 4294967232 }
 0x35d   :  { %1367 = vsyncpa [#allocation5], 1 }
 0x35e   :  { %1368 = vsyncpa [#allocation6], 1 }

</bundles_post_ra>
